<compile_context>
chip_gen: v7x
topology: tpu7x:2x2x1
jax: 0.10.0
libtpu: 0.0.40
codegen_flags: <defaults>
</compile_context>

<pallas_src>
import functools

import jax
import jax.numpy as jnp
from jax.experimental import pallas as pl
from jax.experimental.pallas import tpu as pltpu

LANE = 128
VMEM_LIMIT_BYTES = 48 * 1024 * 1024   # safe scoped-VMEM budget across v5e/v6e/v7x


# --------------------------------------------------------------------------
# tiling helpers
# --------------------------------------------------------------------------

def _round_up(x, m):
    return ((x + m - 1) // m) * m


def _row_tiling(rows, target=512):
    """Pick (row_tile, padded_rows): tiles are multiples of 8 and <= `target` rows.
    No forced multi-tile split (single-TC v5e/v6e pay pure per-step overhead for it)."""
    rows8 = max(8, _round_up(rows, 8))
    n_tiles = -(-rows8 // target)
    tile = _round_up(-(-rows8 // n_tiles), 8)
    return tile, tile * n_tiles


def _cparams():
    return pltpu.CompilerParams(dimension_semantics=("parallel",),
                                vmem_limit_bytes=VMEM_LIMIT_BYTES)


# --------------------------------------------------------------------------
# Pallas kernels (matmul / MLP hot paths)  -- bf16 inputs, f32 accumulation
# --------------------------------------------------------------------------

def _linear_kernel(x_ref, w_ref, b_ref, o_ref):
    y = jnp.dot(x_ref[...], w_ref[...], preferred_element_type=jnp.float32)
    o_ref[...] = y + b_ref[...]


def _edge_kernel(xe_ref, w1_ref, b1_ref, w2_ref, b2_ref,
                 wc1_ref, bc1_ref, wc2_ref, m_ref, cw_ref):
    # fused: radial_linear + edge_mlp layer 1 over concat([h_i, h_j, rflat, edge_attr])
    z = jnp.dot(xe_ref[...], w1_ref[...],
                preferred_element_type=jnp.float32) + b1_ref[...]
    z = z * jax.nn.sigmoid(z)                                        # SiLU (f32)
    m = jnp.dot(z.astype(jnp.bfloat16), w2_ref[...],
                preferred_element_type=jnp.float32) + b2_ref[...]
    m = m * jax.nn.sigmoid(m)                                        # SiLU
    # coord_mlp: Linear -> SiLU -> Linear(no bias, tiny init)
    c = jnp.dot(m.astype(jnp.bfloat16), wc1_ref[...],
                preferred_element_type=jnp.float32) + bc1_ref[...]
    c = c * jax.nn.sigmoid(c)
    cw = jnp.dot(c.astype(jnp.bfloat16), wc2_ref[...],
                 preferred_element_type=jnp.float32)
    m_ref[...] = m.astype(m_ref.dtype)                               # bf16, lane-dense
    cw_ref[...] = cw.astype(cw_ref.dtype)                            # bf16, lane-dense


def _node_kernel(h_ref, agg_ref, w1h_ref, w1a_ref, b1_ref, w2_ref, b2_ref, o_ref):
    h32 = h_ref[...]                                                 # f32 for residual
    z = (jnp.dot(h32.astype(jnp.bfloat16), w1h_ref[...],
                 preferred_element_type=jnp.float32)
         + jnp.dot(agg_ref[...], w1a_ref[...],
                   preferred_element_type=jnp.float32)
         + b1_ref[...])
    z = z * jax.nn.sigmoid(z)                                        # SiLU
    out = jnp.dot(z.astype(jnp.bfloat16), w2_ref[...],
                  preferred_element_type=jnp.float32) + b2_ref[...]
    o_ref[...] = h32 + out                                           # residual


# --------------------------------------------------------------------------
# pallas_call wrappers
# --------------------------------------------------------------------------

def _whole(a):
    # grid-invariant operand (weights / biases): whole-array block.
    return pl.BlockSpec(a.shape, lambda i: (0, 0))


def pallas_linear(x_bf16, w_bf16, b_f32, bm):
    M, K = x_bf16.shape
    Nout = w_bf16.shape[1]
    assert M % bm == 0
    return pl.pallas_call(
        _linear_kernel,
        out_shape=jax.ShapeDtypeStruct((M, Nout), jnp.float32),
        grid=(M // bm,),
        in_specs=[pl.BlockSpec((bm, K), lambda i: (i, 0)),
                  _whole(w_bf16), _whole(b_f32)],
        out_specs=pl.BlockSpec((bm, Nout), lambda i: (i, 0)),
        compiler_params=_cparams(),
    )(x_bf16, w_bf16, b_f32)


def pallas_edge(xe_bf16, lp, be):
    Ep, K = xe_bf16.shape
    hid_pad = lp["w2"].shape[1]
    c_pad = lp["wc2"].shape[1]
    assert Ep % be == 0
    return pl.pallas_call(
        _edge_kernel,
        out_shape=(jax.ShapeDtypeStruct((Ep, hid_pad), jnp.bfloat16),
                   jax.ShapeDtypeStruct((Ep, c_pad), jnp.bfloat16)),
        grid=(Ep // be,),
        in_specs=[pl.BlockSpec((be, K), lambda i: (i, 0)),
                  _whole(lp["w1"]), _whole(lp["b1"]),
                  _whole(lp["w2"]), _whole(lp["b2"]),
                  _whole(lp["wc1"]), _whole(lp["bc1"]), _whole(lp["wc2"])],
        out_specs=(pl.BlockSpec((be, hid_pad), lambda i: (i, 0)),
                   pl.BlockSpec((be, c_pad), lambda i: (i, 0))),
        compiler_params=_cparams(),
    )(xe_bf16, lp["w1"], lp["b1"], lp["w2"], lp["b2"],
      lp["wc1"], lp["bc1"], lp["wc2"])


def pallas_node(h_f32, agg_bf16, lp, bm):
    Np, hid_pad = h_f32.shape
    assert Np % bm == 0
    return pl.pallas_call(
        _node_kernel,
        out_shape=jax.ShapeDtypeStruct((Np, hid_pad), jnp.float32),
        grid=(Np // bm,),
        in_specs=[pl.BlockSpec((bm, hid_pad), lambda i: (i, 0)),
                  pl.BlockSpec((bm, hid_pad), lambda i: (i, 0)),
                  _whole(lp["n_w1_h"]), _whole(lp["n_w1_a"]), _whole(lp["n_b1"]),
                  _whole(lp["n_w2"]), _whole(lp["n_b2"])],
        out_specs=pl.BlockSpec((bm, hid_pad), lambda i: (i, 0)),
        compiler_params=_cparams(),
    )(h_f32, agg_bf16, lp["n_w1_h"], lp["n_w1_a"], lp["n_b1"],
      lp["n_w2"], lp["n_b2"])


# --------------------------------------------------------------------------
# parameters: logical (unpadded f32) init + kernel-ready packing (pad + bf16)
# --------------------------------------------------------------------------

def _dense(key, shape, scale=None):
    if scale is None:
        scale = 1.0 / float(shape[0]) ** 0.5
    return scale * jax.random.normal(key, shape, dtype=jnp.float32)


def init_params(key, input_size, hidden_size, n_channel, n_layers, edge_size=0):
    atom_embed_size = hidden_size // 4
    edge_embed_size = hidden_size // 4
    enc_in = input_size + 3 + input_size          # H + t_embed + position_embedding
    edge_nf = edge_embed_size + edge_size
    radial_nf = hidden_size
    cnf = atom_embed_size

    keys = iter(jax.random.split(key, 256))
    params = {
        "edge_embedding": _dense(next(keys), (2, edge_embed_size), scale=1.0),
        "linear_in_w": _dense(next(keys), (enc_in, hidden_size)),
        "linear_in_b": jnp.zeros((1, hidden_size), jnp.float32),
        "linear_out_w": _dense(next(keys), (hidden_size, hidden_size)),
        "linear_out_b": jnp.zeros((1, hidden_size), jnp.float32),
        "hidden2input_w": _dense(next(keys), (hidden_size, input_size)),
        "hidden2input_b": jnp.zeros((1, input_size), jnp.float32),
    }
    layers = []
    for _ in range(n_layers):
        p = {
            "rad_w": _dense(next(keys), (cnf * cnf, radial_nf)),
            "rad_b": jnp.zeros((1, radial_nf), jnp.float32),
            "e_w1_hr": _dense(next(keys), (hidden_size, hidden_size)),
            "e_w1_hc": _dense(next(keys), (hidden_size, hidden_size)),
            "e_w1_r": _dense(next(keys), (radial_nf, hidden_size)),
            "e_w1_e": _dense(next(keys), (edge_nf, hidden_size)),
            "e_b1": jnp.zeros((1, hidden_size), jnp.float32),
            "e_w2": _dense(next(keys), (hidden_size, hidden_size)),
            "e_b2": jnp.zeros((1, hidden_size), jnp.float32),
            "c_w1": _dense(next(keys), (hidden_size, hidden_size)),
            "c_b1": jnp.zeros((1, hidden_size), jnp.float32),
            "c_w2": _dense(next(keys), (hidden_size, n_channel), scale=0.001),
            "n_w1_h": _dense(next(keys), (hidden_size, hidden_size)),
            "n_w1_a": _dense(next(keys), (hidden_size, hidden_size)),
            "n_b1": jnp.zeros((1, hidden_size), jnp.float32),
            "n_w2": _dense(next(keys), (hidden_size, hidden_size)),
            "n_b2": jnp.zeros((1, hidden_size), jnp.float32),
        }
        layers.append(p)
    params["layers"] = layers
    return params


def pad_params(params, input_size, hidden_size, n_channel, edge_size=0):
    """Pre-pack parameters for the Pallas kernels: lane dims padded to multiples of
    128; radial_linear and the 4-way edge_mlp-layer-1 matmuls composed / concatenated
    into ONE fused (K_edge_pad, hid_pad) weight; the output head (linear_out followed
    by hidden2input, no nonlinearity / eval-mode dropout in between) composed into a
    single (hid_pad, in_size_pad) weight; weights cast to bf16, biases stay f32."""
    cnf = hidden_size // 4
    edge_embed = hidden_size // 4
    edge_nf = edge_embed + edge_size
    enc_in = input_size + 3 + input_size

    hid_pad = _round_up(hidden_size, LANE)
    enc_in_pad = _round_up(enc_in, LANE)
    in_size_pad = _round_up(input_size, LANE)
    c_pad = _round_up(n_channel, LANE)
    k_edge = 2 * hid_pad + cnf * cnf + edge_nf          # [h_i | h_j | rflat | e_attr]
    k_edge_pad = _round_up(k_edge, LANE)

    def pad_w(a, rows, cols):
        out = jnp.zeros((rows, cols), jnp.float32)
        return out.at[:a.shape[0], :a.shape[1]].set(a).astype(jnp.bfloat16)

    def pad_b(a, cols):
        return jnp.zeros((1, cols), jnp.float32).at[:, :a.shape[1]].set(a)

    # fused output head (valid: no activation; dropout is identity in eval)
    head_w = params["linear_out_w"] @ params["hidden2input_w"]
    head_b = params["linear_out_b"] @ params["hidden2input_w"] + params["hidden2input_b"]

    kp = {
        "edge_embedding": params["edge_embedding"],
        "linear_in_w": pad_w(params["linear_in_w"], enc_in_pad, hid_pad),
        "linear_in_b": pad_b(params["linear_in_b"], hid_pad),
        "head_w": pad_w(head_w, hid_pad, in_size_pad),
        "head_b": pad_b(head_b, in_size_pad),
        "layers": [],
    }
    for p in params["layers"]:
        # radial_linear is a pure Linear feeding edge_mlp layer 1, so it composes
        # exactly into the fused weight:  rflat @ (rad_w @ w1_r)  (+ rad_b @ w1_r bias)
        w1r_eff = p["rad_w"] @ p["e_w1_r"]                 # (cnf*cnf, hidden)
        b1_eff = p["e_b1"] + p["rad_b"] @ p["e_w1_r"]      # (1, hidden)
        w1 = jnp.zeros((k_edge_pad, hid_pad), jnp.float32)
        w1 = w1.at[0:hidden_size, :hidden_size].set(p["e_w1_hr"])
        w1 = w1.at[hid_pad:hid_pad + hidden_size, :hidden_size].set(p["e_w1_hc"])
        w1 = w1.at[2 * hid_pad:2 * hid_pad + cnf * cnf, :hidden_size].set(w1r_eff)
        w1 = w1.at[2 * hid_pad + cnf * cnf:
                   2 * hid_pad + cnf * cnf + edge_nf, :hidden_size].set(p["e_w1_e"])
        kp["layers"].append({
            "w1": w1.astype(jnp.bfloat16),
            "b1": pad_b(b1_eff, hid_pad),
            "w2": pad_w(p["e_w2"], hid_pad, hid_pad),
            "b2": pad_b(p["e_b2"], hid_pad),
            "wc1": pad_w(p["c_w1"], hid_pad, hid_pad),
            "bc1": pad_b(p["c_b1"], hid_pad),
            "wc2": pad_w(p["c_w2"], hid_pad, c_pad),
            "n_w1_h": pad_w(p["n_w1_h"], hid_pad, hid_pad),
            "n_w1_a": pad_w(p["n_w1_a"], hid_pad, hid_pad),
            "n_b1": pad_b(p["n_b1"], hid_pad),
            "n_w2": pad_w(p["n_w2"], hid_pad, hid_pad),
            "n_b2": pad_b(p["n_b2"], hid_pad),
        })
    dims = dict(hid=hidden_size, hid_pad=hid_pad, enc_in_pad=enc_in_pad,
                in_size=input_size, in_size_pad=in_size_pad, c_pad=c_pad,
                cnf=cnf, edge_nf=edge_nf, k_edge=k_edge, k_edge_pad=k_edge_pad)
    return kp, dims


# --------------------------------------------------------------------------
# JAX glue: graph gathers / sorted segment reductions, geometry pooling
# --------------------------------------------------------------------------

def radial_pool(x_row, x_col, a_row, a_col, w_row, w_col, eps=1e-8):
    """Adaptive multi-channel radial feature pooled with atom embeddings /
    atom-existence weights.  Factorized form: mathematically identical to the
    (E, C, C) pairwise-distance version, but never materializes that tensor."""
    sq_r = jnp.sum(x_row * x_row, axis=-1)                       # (E, C)
    sq_c = jnp.sum(x_col * x_col, axis=-1)                       # (E, C)
    ar_w = a_row * w_row[..., None]                              # (E, C, cnf)
    ac_w = a_col * w_col[..., None]                              # (E, C, cnf)
    u0 = jnp.sum(ar_w, axis=1)                                   # (E, cnf)
    v0 = jnp.sum(ac_w, axis=1)                                   # (E, cnf)
    u1 = jnp.einsum("ec,eca->ea", sq_r, ar_w)                    # (E, cnf)
    v1 = jnp.einsum("ec,ecb->eb", sq_c, ac_w)                    # (E, cnf)
    U = jnp.einsum("ecd,eca->eda", x_row, ar_w)                  # (E, 3, cnf)
    V = jnp.einsum("ecd,ecb->edb", x_col, ac_w)                  # (E, 3, cnf)
    pooled = (u1[:, :, None] * v0[:, None, :]
              + u0[:, :, None] * v1[:, None, :]
              - 2.0 * jnp.einsum("eda,edb->eab", U, V))          # (E, cnf, cnf)
    denom = (jnp.sum(w_row, -1) * jnp.sum(w_col, -1))[:, None, None] + eps
    pooled = pooled / denom
    return pooled.reshape(pooled.shape[0], -1)                   # (E, cnf*cnf)


def am_e_gcl(lp, dims, h, x, row, col, edge_attr_bf16,
             a_row, a_col, w_row, w_col, inv_deg,
             N, Np, bm_n, E, Ep, be):
    x_row, x_col = x[row], x[col]
    rflat = radial_pool(x_row, x_col, a_row, a_col, w_row, w_col)    # (E, cnf*cnf) f32

    # one lane-dense fused bf16 input  [h_i | h_j | rflat | edge_attr], rows -> Ep
    xe = jnp.concatenate([h[row].astype(jnp.bfloat16),
                          h[col].astype(jnp.bfloat16),
                          rflat.astype(jnp.bfloat16),
                          edge_attr_bf16], axis=-1)
    xe = jnp.pad(xe, ((0, Ep - E), (0, dims["k_edge_pad"] - xe.shape[1])))
    m_full, cw_full = pallas_edge(xe, lp, be)
    # padded rows produce nonzero m/cw (bias->SiLU on zero input): keep the [:E] slices
    m = m_full[:E].astype(jnp.float32)                               # f32 accumulation
    cw = cw_full[:E, :x.shape[1]].astype(jnp.float32)                # (E, C)

    # equivariant coordinate update (mean over incoming messages); row is sorted so
    # this is a sorted segment reduction rather than an XLA scatter
    trans = (x_row - x_col) * cw[:, :, None]                         # (E, C, 3)
    seg = jax.ops.segment_sum(trans, row, num_segments=N,
                              indices_are_sorted=True)
    x_new = x + seg * inv_deg[:, None, None]

    # node update: sorted segment-sum of messages + Pallas node MLP (+residual)
    agg = jax.ops.segment_sum(m, row, num_segments=Np,
                              indices_are_sorted=True)               # (Np, hid_pad) f32
    h_new = pallas_node(h, agg.astype(jnp.bfloat16), lp, bm_n)
    return h_new, x_new


def epsilon_net_forward(kp, dims, H_noisy, X_noisy, position_embedding,
                        ctx_edges, inter_edges, atom_embeddings, atom_weights,
                        mask_generate, beta):
    N = H_noisy.shape[0]
    bm_n, Np = _row_tiling(N)

    # t embedding + input feature concat (glue), rows + lanes padded for the kernels
    t_embed = jnp.stack([beta, jnp.sin(beta), jnp.cos(beta)], axis=-1)   # (N, 3)
    in_feat = jnp.concatenate([H_noisy, t_embed, position_embedding], axis=-1)
    in_feat = jnp.pad(in_feat, ((0, Np - N), (0, dims["enc_in_pad"] - in_feat.shape[1])))

    # edges + edge-type embedding (0 = ctx, 1 = inter)
    edges = jnp.concatenate([ctx_edges, inter_edges], axis=-1)           # (2, E)
    edge_type = jnp.concatenate(
        [jnp.zeros((ctx_edges.shape[1],), jnp.int32),
         jnp.ones((inter_edges.shape[1],), jnp.int32)], axis=-1)
    row, col = edges[0], edges[1]
    E = row.shape[0]
    be, Ep = _row_tiling(E)

    # sort edges by destination node ONCE (layer-invariant) so per-layer aggregations
    # become sorted segment reductions; aggregation is permutation-invariant so the
    # reorder does not change semantics
    order = jnp.argsort(row)
    row, col, edge_type = row[order], col[order], edge_type[order]
    edge_attr_bf16 = jnp.take(kp["edge_embedding"], edge_type, axis=0).astype(jnp.bfloat16)

    # layer-invariant per-edge gathers + degree normalizer (hoisted out of layer loop)
    a_row, a_col = atom_embeddings[row], atom_embeddings[col]
    w_row, w_col = atom_weights[row], atom_weights[col]
    deg = jax.ops.segment_sum(jnp.ones((E,), jnp.float32), row, num_segments=N,
                              indices_are_sorted=True)
    inv_deg = 1.0 / jnp.maximum(deg, 1.0)

    # AMEGNN encoder
    h = pallas_linear(in_feat.astype(jnp.bfloat16),
                      kp["linear_in_w"], kp["linear_in_b"], bm_n)        # (Np, hid_pad)
    x = X_noisy
    for lp in kp["layers"]:
        h, x = am_e_gcl(lp, dims, h, x, row, col, edge_attr_bf16,
                        a_row, a_col, w_row, w_col, inv_deg,
                        N, Np, bm_n, E, Ep, be)

    # fused output head: encoder.linear_out ∘ hidden2input in ONE Pallas matmul
    nh = pallas_linear(h.astype(jnp.bfloat16), kp["head_w"], kp["head_b"], bm_n)
    nh = nh[:N, :dims["in_size"]]
    next_X = x

    eps_H = jnp.where(mask_generate[:, None], nh - H_noisy, 0.0)
    eps_X = jnp.where(mask_generate[:, None, None], next_X - X_noisy, 0.0)
    return eps_H, eps_X


# --------------------------------------------------------------------------

if __name__ == "__main__":
    input_size, hidden_size, n_channel, n_layers = 16, 32, 14, 3
    N = 8

    key = jax.random.PRNGKey(0)
    k_par, k_h, k_x, k_pos, k_emb, k_beta = jax.random.split(key, 6)
    params = init_params(k_par, input_size, hidden_size, n_channel, n_layers)
    kparams, dims = pad_params(params, input_size, hidden_size, n_channel)

    H_noisy = jax.random.normal(k_h, (N, input_size), jnp.float32)
    X_noisy = jax.random.normal(k_x, (N, n_channel, 3), jnp.float32)
    position_embedding = jax.random.normal(k_pos, (N, input_size), jnp.float32)
    atom_embeddings = jax.random.normal(k_emb, (N, n_channel, hidden_size // 4),
                                        jnp.float32)
    atom_weights = (jnp.arange(n_channel)[None, :]
                    < (4 + jnp.arange(N)[:, None] % 8)).astype(jnp.float32)
    beta = jax.random.uniform(k_beta, (N,), jnp.float32)
    mask_generate = jnp.arange(N) >= N // 2

    ctx_edges = jnp.array([[0, 1, 1, 2, 2, 3, 4, 5, 5, 6, 6, 7],
                           [1, 0, 2, 1, 3, 2, 5, 4, 6, 5, 7, 6]], dtype=jnp.int32)
    inter_edges = jnp.array([[0, 4, 3, 7],
                             [4, 0, 7, 3]], dtype=jnp.int32)

    fwd = jax.jit(functools.partial(epsilon_net_forward, kparams, dims))
    eps_H, eps_X = fwd(H_noisy, X_noisy, position_embedding, ctx_edges, inter_edges,
                       atom_embeddings, atom_weights, mask_generate, beta)
    jax.block_until_ready((eps_H, eps_X))
    assert eps_H.shape == (N, input_size) and eps_X.shape == (N, n_channel, 3)
    assert bool(jnp.all(jnp.isfinite(eps_H))) and bool(jnp.all(jnp.isfinite(eps_X)))
    print("KERNEL_OK")
</pallas_src>

<mosaic_0001>
module attributes {stable_mosaic.version = 11 : i64} {
  func.func private @main(%arg0: i32) attributes {dimension_semantics = [#tpu.dimension_semantics<core_parallel>], iteration_bounds = array<i64: 2>, tpu.core_type = #tpu.core_type<sc_scalar_subcore>, window_params = []} {
    return
  }
}

module attributes {stable_mosaic.version = 11 : i64} {
  func.func private @main(%arg0: i32) attributes {dimension_semantics = [#tpu.dimension_semantics<core_parallel>], iteration_bounds = array<i64: 2>, tpu.core_type = #tpu.core_type<sc_scalar_subcore>, window_params = []} {
    return
  }
}

module attributes {stable_mosaic.version = 11 : i64} {
  func.func @_linear_kernel(%arg0: i32, %arg1: memref<8x128xbf16, #tpu.memory_space<vmem>>, %arg2: memref<128x128xbf16, #tpu.memory_space<vmem>>, %arg3: memref<1x128xf32, #tpu.memory_space<vmem>>, %arg4: memref<8x128xf32, #tpu.memory_space<vmem>>) attributes {dimension_semantics = [#tpu.dimension_semantics<parallel>], iteration_bounds = array<i64: 1>, scalar_prefetch = 0 : i64, scratch_operands = 0 : i64, tpu.core_type = #tpu.core_type<tc>, window_params = [{transform_indices = @transform_0, window_bounds = array<i64: 8, 128>}, {pipeline_mode = #tpu.pipeline_mode<synchronous>, transform_indices = @transform_1, window_bounds = array<i64: 128, 128>}, {pipeline_mode = #tpu.pipeline_mode<synchronous>, transform_indices = @transform_2, window_bounds = array<i64: 1, 128>}, {transform_indices = @transform_3, window_bounds = array<i64: 8, 128>}]} {
    %c0 = arith.constant 0 : index
    %c0_0 = arith.constant 0 : index
    %0 = vector.load %arg1[%c0, %c0_0] : memref<8x128xbf16, #tpu.memory_space<vmem>>, vector<8x128xbf16>
    %c0_1 = arith.constant 0 : index
    %c0_2 = arith.constant 0 : index
    %1 = vector.load %arg2[%c0_1, %c0_2] : memref<128x128xbf16, #tpu.memory_space<vmem>>, vector<128x128xbf16>
    %cst = arith.constant dense<0.000000e+00> : vector<8x128xf32>
    %2 = tpu.matmul %0, %1, %cst {dimension_numbers = #tpu.dot_dimension_numbers<[1], [0], [0], [1], [0, 0, 1, 1], [], []>} : vector<8x128xbf16>, vector<128x128xbf16>, vector<8x128xf32> -> vector<8x128xf32>
    %c0_3 = arith.constant 0 : index
    %c0_4 = arith.constant 0 : index
    %3 = vector.load %arg3[%c0_3, %c0_4] : memref<1x128xf32, #tpu.memory_space<vmem>>, vector<1x128xf32>
    %4 = vector.broadcast %3 : vector<1x128xf32> to vector<8x128xf32>
    %5 = arith.addf %2, %4 : vector<8x128xf32>
    %c0_5 = arith.constant 0 : index
    %c0_6 = arith.constant 0 : index
    %6 = vector.load %arg4[%c0_5, %c0_6] : memref<8x128xf32, #tpu.memory_space<vmem>>, vector<8x128xf32>
    tpu.vector_store %arg4[%c0_5, %c0_6], %5 {strides = array<i32>} : memref<8x128xf32, #tpu.memory_space<vmem>>, vector<8x128xf32>,
    return
  }
  func.func @transform_0(%arg0: i32) -> (i32, i32) {
    %c0_i32 = arith.constant 0 : i32
    %c0_i32_0 = arith.constant 0 : i32
    return %arg0, %c0_i32 : i32, i32
  }
  func.func @transform_1(%arg0: i32) -> (i32, i32) {
    %c0_i32 = arith.constant 0 : i32
    %c0_i32_0 = arith.constant 0 : i32
    %c0_i32_1 = arith.constant 0 : i32
    return %c0_i32, %c0_i32_0 : i32, i32
  }
  func.func @transform_2(%arg0: i32) -> (i32, i32) {
    %c0_i32 = arith.constant 0 : i32
    %c0_i32_0 = arith.constant 0 : i32
    %c0_i32_1 = arith.constant 0 : i32
    return %c0_i32, %c0_i32_0 : i32, i32
  }
  func.func @transform_3(%arg0: i32) -> (i32, i32) {
    %c0_i32 = arith.constant 0 : i32
    %c0_i32_0 = arith.constant 0 : i32
    return %arg0, %c0_i32 : i32, i32
  }
}

module attributes {stable_mosaic.version = 11 : i64} {
  func.func @_edge_kernel(%arg0: i32, %arg1: memref<16x384xbf16, #tpu.memory_space<vmem>>, %arg2: memref<384x128xbf16, #tpu.memory_space<vmem>>, %arg3: memref<1x128xf32, #tpu.memory_space<vmem>>, %arg4: memref<128x128xbf16, #tpu.memory_space<vmem>>, %arg5: memref<1x128xf32, #tpu.memory_space<vmem>>, %arg6: memref<128x128xbf16, #tpu.memory_space<vmem>>, %arg7: memref<1x128xf32, #tpu.memory_space<vmem>>, %arg8: memref<128x128xbf16, #tpu.memory_space<vmem>>, %arg9: memref<16x128xbf16, #tpu.memory_space<vmem>>, %arg10: memref<16x128xbf16, #tpu.memory_space<vmem>>) attributes {dimension_semantics = [#tpu.dimension_semantics<parallel>], iteration_bounds = array<i64: 1>, scalar_prefetch = 0 : i64, scratch_operands = 0 : i64, tpu.core_type = #tpu.core_type<tc>, window_params = [{transform_indices = @transform_0, window_bounds = array<i64: 16, 384>}, {pipeline_mode = #tpu.pipeline_mode<synchronous>, transform_indices = @transform_1, window_bounds = array<i64: 384, 128>}, {pipeline_mode = #tpu.pipeline_mode<synchronous>, transform_indices = @transform_2, window_bounds = array<i64: 1, 128>}, {pipeline_mode = #tpu.pipeline_mode<synchronous>, transform_indices = @transform_3, window_bounds = array<i64: 128, 128>}, {pipeline_mode = #tpu.pipeline_mode<synchronous>, transform_indices = @transform_4, window_bounds = array<i64: 1, 128>}, {pipeline_mode = #tpu.pipeline_mode<synchronous>, transform_indices = @transform_5, window_bounds = array<i64: 128, 128>}, {pipeline_mode = #tpu.pipeline_mode<synchronous>, transform_indices = @transform_6, window_bounds = array<i64: 1, 128>}, {pipeline_mode = #tpu.pipeline_mode<synchronous>, transform_indices = @transform_7, window_bounds = array<i64: 128, 128>}, {transform_indices = @transform_8, window_bounds = array<i64: 16, 128>}, {transform_indices = @transform_9, window_bounds = array<i64: 16, 128>}]} {
    %c0 = arith.constant 0 : index
    %c0_0 = arith.constant 0 : index
    %0 = vector.load %arg1[%c0, %c0_0] : memref<16x384xbf16, #tpu.memory_space<vmem>>, vector<16x384xbf16>
    %c0_1 = arith.constant 0 : index
    %c0_2 = arith.constant 0 : index
    %1 = vector.load %arg2[%c0_1, %c0_2] : memref<384x128xbf16, #tpu.memory_space<vmem>>, vector<384x128xbf16>
    %cst = arith.constant dense<0.000000e+00> : vector<16x128xf32>
    %2 = tpu.matmul %0, %1, %cst {dimension_numbers = #tpu.dot_dimension_numbers<[1], [0], [0], [1], [0, 0, 1, 1], [], []>} : vector<16x384xbf16>, vector<384x128xbf16>, vector<16x128xf32> -> vector<16x128xf32>
    %c0_3 = arith.constant 0 : index
    %c0_4 = arith.constant 0 : index
    %3 = vector.load %arg3[%c0_3, %c0_4] : memref<1x128xf32, #tpu.memory_space<vmem>>, vector<1x128xf32>
    %4 = vector.broadcast %3 : vector<1x128xf32> to vector<16x128xf32>
    %5 = arith.addf %2, %4 : vector<16x128xf32>
    %6 = arith.negf %5 : vector<16x128xf32>
    %7 = math.exp %6 : vector<16x128xf32>
    %cst_5 = arith.constant 1.000000e+00 : f32
    %8 = vector.broadcast %cst_5 : f32 to vector<16x128xf32>
    %9 = arith.addf %8, %7 : vector<16x128xf32>
    %10 = arith.divf %8, %9 : vector<16x128xf32>
    %11 = arith.mulf %5, %10 : vector<16x128xf32>
    %12 = arith.truncf %11 : vector<16x128xf32> to vector<16x128xbf16>
    %c0_6 = arith.constant 0 : index
    %c0_7 = arith.constant 0 : index
    %13 = vector.load %arg4[%c0_6, %c0_7] : memref<128x128xbf16, #tpu.memory_space<vmem>>, vector<128x128xbf16>
    %cst_8 = arith.constant dense<0.000000e+00> : vector<16x128xf32>
    %14 = tpu.matmul %12, %13, %cst_8 {dimension_numbers = #tpu.dot_dimension_numbers<[1], [0], [0], [1], [0, 0, 1, 1], [], []>} : vector<16x128xbf16>, vector<128x128xbf16>, vector<16x128xf32> -> vector<16x128xf32>
    %c0_9 = arith.constant 0 : index
    %c0_10 = arith.constant 0 : index
    %15 = vector.load %arg5[%c0_9, %c0_10] : memref<1x128xf32, #tpu.memory_space<vmem>>, vector<1x128xf32>
    %16 = vector.broadcast %15 : vector<1x128xf32> to vector<16x128xf32>
    %17 = arith.addf %14, %16 : vector<16x128xf32>
    %18 = arith.negf %17 : vector<16x128xf32>
    %19 = math.exp %18 : vector<16x128xf32>
    %cst_11 = arith.constant 1.000000e+00 : f32
    %20 = vector.broadcast %cst_11 : f32 to vector<16x128xf32>
    %21 = arith.addf %20, %19 : vector<16x128xf32>
    %22 = arith.divf %20, %21 : vector<16x128xf32>
    %23 = arith.mulf %17, %22 : vector<16x128xf32>
    %24 = arith.truncf %23 : vector<16x128xf32> to vector<16x128xbf16>
    %c0_12 = arith.constant 0 : index
    %c0_13 = arith.constant 0 : index
    %25 = vector.load %arg6[%c0_12, %c0_13] : memref<128x128xbf16, #tpu.memory_space<vmem>>, vector<128x128xbf16>
    %cst_14 = arith.constant dense<0.000000e+00> : vector<16x128xf32>
    %26 = tpu.matmul %24, %25, %cst_14 {dimension_numbers = #tpu.dot_dimension_numbers<[1], [0], [0], [1], [0, 0, 1, 1], [], []>} : vector<16x128xbf16>, vector<128x128xbf16>, vector<16x128xf32> -> vector<16x128xf32>
    %c0_15 = arith.constant 0 : index
    %c0_16 = arith.constant 0 : index
    %27 = vector.load %arg7[%c0_15, %c0_16] : memref<1x128xf32, #tpu.memory_space<vmem>>, vector<1x128xf32>
    %28 = vector.broadcast %27 : vector<1x128xf32> to vector<16x128xf32>
    %29 = arith.addf %26, %28 : vector<16x128xf32>
    %30 = arith.negf %29 : vector<16x128xf32>
    %31 = math.exp %30 : vector<16x128xf32>
    %cst_17 = arith.constant 1.000000e+00 : f32
    %32 = vector.broadcast %cst_17 : f32 to vector<16x128xf32>
    %33 = arith.addf %32, %31 : vector<16x128xf32>
    %34 = arith.divf %32, %33 : vector<16x128xf32>
    %35 = arith.mulf %29, %34 : vector<16x128xf32>
    %36 = arith.truncf %35 : vector<16x128xf32> to vector<16x128xbf16>
    %c0_18 = arith.constant 0 : index
    %c0_19 = arith.constant 0 : index
    %37 = vector.load %arg8[%c0_18, %c0_19] : memref<128x128xbf16, #tpu.memory_space<vmem>>, vector<128x128xbf16>
    %cst_20 = arith.constant dense<0.000000e+00> : vector<16x128xf32>
    %38 = tpu.matmul %36, %37, %cst_20 {dimension_numbers = #tpu.dot_dimension_numbers<[1], [0], [0], [1], [0, 0, 1, 1], [], []>} : vector<16x128xbf16>, vector<128x128xbf16>, vector<16x128xf32> -> vector<16x128xf32>
    %39 = arith.truncf %23 : vector<16x128xf32> to vector<16x128xbf16>
    %c0_21 = arith.constant 0 : index
    %c0_22 = arith.constant 0 : index
    %40 = vector.load %arg9[%c0_21, %c0_22] : memref<16x128xbf16, #tpu.memory_space<vmem>>, vector<16x128xbf16>
    tpu.vector_store %arg9[%c0_21, %c0_22], %39 {strides = array<i32>} : memref<16x128xbf16, #tpu.memory_space<vmem>>, vector<16x128xbf16>,
    %41 = arith.truncf %38 : vector<16x128xf32> to vector<16x128xbf16>
    %c0_23 = arith.constant 0 : index
    %c0_24 = arith.constant 0 : index
    %42 = vector.load %arg10[%c0_23, %c0_24] : memref<16x128xbf16, #tpu.memory_space<vmem>>, vector<16x128xbf16>
    tpu.vector_store %arg10[%c0_23, %c0_24], %41 {strides = array<i32>} : memref<16x128xbf16, #tpu.memory_space<vmem>>, vector<16x128xbf16>,
    return
  }
  func.func @transform_0(%arg0: i32) -> (i32, i32) {
    %c0_i32 = arith.constant 0 : i32
    %c0_i32_0 = arith.constant 0 : i32
    return %arg0, %c0_i32 : i32, i32
  }
  func.func @transform_1(%arg0: i32) -> (i32, i32) {
    %c0_i32 = arith.constant 0 : i32
    %c0_i32_0 = arith.constant 0 : i32
    %c0_i32_1 = arith.constant 0 : i32
    return %c0_i32, %c0_i32_0 : i32, i32
  }
  func.func @transform_2(%arg0: i32) -> (i32, i32) {
    %c0_i32 = arith.constant 0 : i32
    %c0_i32_0 = arith.constant 0 : i32
    %c0_i32_1 = arith.constant 0 : i32
    return %c0_i32, %c0_i32_0 : i32, i32
  }
  func.func @transform_3(%arg0: i32) -> (i32, i32) {
    %c0_i32 = arith.constant 0 : i32
    %c0_i32_0 = arith.constant 0 : i32
    %c0_i32_1 = arith.constant 0 : i32
    return %c0_i32, %c0_i32_0 : i32, i32
  }
  func.func @transform_4(%arg0: i32) -> (i32, i32) {
    %c0_i32 = arith.constant 0 : i32
    %c0_i32_0 = arith.constant 0 : i32
    %c0_i32_1 = arith.constant 0 : i32
    return %c0_i32, %c0_i32_0 : i32, i32
  }
  func.func @transform_5(%arg0: i32) -> (i32, i32) {
    %c0_i32 = arith.constant 0 : i32
    %c0_i32_0 = arith.constant 0 : i32
    %c0_i32_1 = arith.constant 0 : i32
    return %c0_i32, %c0_i32_0 : i32, i32
  }
  func.func @transform_6(%arg0: i32) -> (i32, i32) {
    %c0_i32 = arith.constant 0 : i32
    %c0_i32_0 = arith.constant 0 : i32
    %c0_i32_1 = arith.constant 0 : i32
    return %c0_i32, %c0_i32_0 : i32, i32
  }
  func.func @transform_7(%arg0: i32) -> (i32, i32) {
    %c0_i32 = arith.constant 0 : i32
    %c0_i32_0 = arith.constant 0 : i32
    %c0_i32_1 = arith.constant 0 : i32
    return %c0_i32, %c0_i32_0 : i32, i32
  }
  func.func @transform_8(%arg0: i32) -> (i32, i32) {
    %c0_i32 = arith.constant 0 : i32
    %c0_i32_0 = arith.constant 0 : i32
    return %arg0, %c0_i32 : i32, i32
  }
  func.func @transform_9(%arg0: i32) -> (i32, i32) {
    %c0_i32 = arith.constant 0 : i32
    %c0_i32_0 = arith.constant 0 : i32
    return %arg0, %c0_i32 : i32, i32
  }
}

module attributes {stable_mosaic.version = 11 : i64} {
  func.func @_node_kernel(%arg0: i32, %arg1: memref<8x128xf32, #tpu.memory_space<vmem>>, %arg2: memref<8x128xbf16, #tpu.memory_space<vmem>>, %arg3: memref<128x128xbf16, #tpu.memory_space<vmem>>, %arg4: memref<128x128xbf16, #tpu.memory_space<vmem>>, %arg5: memref<1x128xf32, #tpu.memory_space<vmem>>, %arg6: memref<128x128xbf16, #tpu.memory_space<vmem>>, %arg7: memref<1x128xf32, #tpu.memory_space<vmem>>, %arg8: memref<8x128xf32, #tpu.memory_space<vmem>>) attributes {dimension_semantics = [#tpu.dimension_semantics<parallel>], iteration_bounds = array<i64: 1>, scalar_prefetch = 0 : i64, scratch_operands = 0 : i64, tpu.core_type = #tpu.core_type<tc>, window_params = [{transform_indices = @transform_0, window_bounds = array<i64: 8, 128>}, {transform_indices = @transform_1, window_bounds = array<i64: 8, 128>}, {pipeline_mode = #tpu.pipeline_mode<synchronous>, transform_indices = @transform_2, window_bounds = array<i64: 128, 128>}, {pipeline_mode = #tpu.pipeline_mode<synchronous>, transform_indices = @transform_3, window_bounds = array<i64: 128, 128>}, {pipeline_mode = #tpu.pipeline_mode<synchronous>, transform_indices = @transform_4, window_bounds = array<i64: 1, 128>}, {pipeline_mode = #tpu.pipeline_mode<synchronous>, transform_indices = @transform_5, window_bounds = array<i64: 128, 128>}, {pipeline_mode = #tpu.pipeline_mode<synchronous>, transform_indices = @transform_6, window_bounds = array<i64: 1, 128>}, {transform_indices = @transform_7, window_bounds = array<i64: 8, 128>}]} {
    %c0 = arith.constant 0 : index
    %c0_0 = arith.constant 0 : index
    %0 = vector.load %arg1[%c0, %c0_0] : memref<8x128xf32, #tpu.memory_space<vmem>>, vector<8x128xf32>
    %1 = arith.truncf %0 : vector<8x128xf32> to vector<8x128xbf16>
    %c0_1 = arith.constant 0 : index
    %c0_2 = arith.constant 0 : index
    %2 = vector.load %arg3[%c0_1, %c0_2] : memref<128x128xbf16, #tpu.memory_space<vmem>>, vector<128x128xbf16>
    %cst = arith.constant dense<0.000000e+00> : vector<8x128xf32>
    %3 = tpu.matmul %1, %2, %cst {dimension_numbers = #tpu.dot_dimension_numbers<[1], [0], [0], [1], [0, 0, 1, 1], [], []>} : vector<8x128xbf16>, vector<128x128xbf16>, vector<8x128xf32> -> vector<8x128xf32>
    %c0_3 = arith.constant 0 : index
    %c0_4 = arith.constant 0 : index
    %4 = vector.load %arg2[%c0_3, %c0_4] : memref<8x128xbf16, #tpu.memory_space<vmem>>, vector<8x128xbf16>
    %c0_5 = arith.constant 0 : index
    %c0_6 = arith.constant 0 : index
    %5 = vector.load %arg4[%c0_5, %c0_6] : memref<128x128xbf16, #tpu.memory_space<vmem>>, vector<128x128xbf16>
    %cst_7 = arith.constant dense<0.000000e+00> : vector<8x128xf32>
    %6 = tpu.matmul %4, %5, %cst_7 {dimension_numbers = #tpu.dot_dimension_numbers<[1], [0], [0], [1], [0, 0, 1, 1], [], []>} : vector<8x128xbf16>, vector<128x128xbf16>, vector<8x128xf32> -> vector<8x128xf32>
    %7 = arith.addf %3, %6 : vector<8x128xf32>
    %c0_8 = arith.constant 0 : index
    %c0_9 = arith.constant 0 : index
    %8 = vector.load %arg5[%c0_8, %c0_9] : memref<1x128xf32, #tpu.memory_space<vmem>>, vector<1x128xf32>
    %9 = vector.broadcast %8 : vector<1x128xf32> to vector<8x128xf32>
    %10 = arith.addf %7, %9 : vector<8x128xf32>
    %11 = arith.negf %10 : vector<8x128xf32>
    %12 = math.exp %11 : vector<8x128xf32>
    %cst_10 = arith.constant 1.000000e+00 : f32
    %13 = vector.broadcast %cst_10 : f32 to vector<8x128xf32>
    %14 = arith.addf %13, %12 : vector<8x128xf32>
    %15 = arith.divf %13, %14 : vector<8x128xf32>
    %16 = arith.mulf %10, %15 : vector<8x128xf32>
    %17 = arith.truncf %16 : vector<8x128xf32> to vector<8x128xbf16>
    %c0_11 = arith.constant 0 : index
    %c0_12 = arith.constant 0 : index
    %18 = vector.load %arg6[%c0_11, %c0_12] : memref<128x128xbf16, #tpu.memory_space<vmem>>, vector<128x128xbf16>
    %cst_13 = arith.constant dense<0.000000e+00> : vector<8x128xf32>
    %19 = tpu.matmul %17, %18, %cst_13 {dimension_numbers = #tpu.dot_dimension_numbers<[1], [0], [0], [1], [0, 0, 1, 1], [], []>} : vector<8x128xbf16>, vector<128x128xbf16>, vector<8x128xf32> -> vector<8x128xf32>
    %c0_14 = arith.constant 0 : index
    %c0_15 = arith.constant 0 : index
    %20 = vector.load %arg7[%c0_14, %c0_15] : memref<1x128xf32, #tpu.memory_space<vmem>>, vector<1x128xf32>
    %21 = vector.broadcast %20 : vector<1x128xf32> to vector<8x128xf32>
    %22 = arith.addf %19, %21 : vector<8x128xf32>
    %23 = arith.addf %0, %22 : vector<8x128xf32>
    %c0_16 = arith.constant 0 : index
    %c0_17 = arith.constant 0 : index
    %24 = vector.load %arg8[%c0_16, %c0_17] : memref<8x128xf32, #tpu.memory_space<vmem>>, vector<8x128xf32>
    tpu.vector_store %arg8[%c0_16, %c0_17], %23 {strides = array<i32>} : memref<8x128xf32, #tpu.memory_space<vmem>>, vector<8x128xf32>,
    return
  }
  func.func @transform_0(%arg0: i32) -> (i32, i32) {
    %c0_i32 = arith.constant 0 : i32
    %c0_i32_0 = arith.constant 0 : i32
    return %arg0, %c0_i32 : i32, i32
  }
  func.func @transform_1(%arg0: i32) -> (i32, i32) {
    %c0_i32 = arith.constant 0 : i32
    %c0_i32_0 = arith.constant 0 : i32
    return %arg0, %c0_i32 : i32, i32
  }
  func.func @transform_2(%arg0: i32) -> (i32, i32) {
    %c0_i32 = arith.constant 0 : i32
    %c0_i32_0 = arith.constant 0 : i32
    %c0_i32_1 = arith.constant 0 : i32
    return %c0_i32, %c0_i32_0 : i32, i32
  }
  func.func @transform_3(%arg0: i32) -> (i32, i32) {
    %c0_i32 = arith.constant 0 : i32
    %c0_i32_0 = arith.constant 0 : i32
    %c0_i32_1 = arith.constant 0 : i32
    return %c0_i32, %c0_i32_0 : i32, i32
  }
  func.func @transform_4(%arg0: i32) -> (i32, i32) {
    %c0_i32 = arith.constant 0 : i32
    %c0_i32_0 = arith.constant 0 : i32
    %c0_i32_1 = arith.constant 0 : i32
    return %c0_i32, %c0_i32_0 : i32, i32
  }
  func.func @transform_5(%arg0: i32) -> (i32, i32) {
    %c0_i32 = arith.constant 0 : i32
    %c0_i32_0 = arith.constant 0 : i32
    %c0_i32_1 = arith.constant 0 : i32
    return %c0_i32, %c0_i32_0 : i32, i32
  }
  func.func @transform_6(%arg0: i32) -> (i32, i32) {
    %c0_i32 = arith.constant 0 : i32
    %c0_i32_0 = arith.constant 0 : i32
    %c0_i32_1 = arith.constant 0 : i32
    return %c0_i32, %c0_i32_0 : i32, i32
  }
  func.func @transform_7(%arg0: i32) -> (i32, i32) {
    %c0_i32 = arith.constant 0 : i32
    %c0_i32_0 = arith.constant 0 : i32
    return %arg0, %c0_i32 : i32, i32
  }
}

</mosaic_0001>

<bundles_post_ra>
// kernel: epsilon_net_forward.8
= control target key start
LH: loop header
LB: loop body
LE: loop exit
PB: predicated region body
PF: predicated region fallthrough
CT: control target
= control target key end

     0   :  { %v180_v0 = vmov 0.0   ;;  %vm181_vm0 = vmmov 0   ;;  %s235_s1 = inlined_call_operand.vmem [shape: bf16[128,128], index: 1, kind: input, shape index: {}]   ;;  %s236_s0 = inlined_call_operand.vmem [shape: bf16[8,128], index: 0, kind: input, shape index: {}]   ;;  %s237_s2 = inlined_call_operand.vmem [shape: f32[1,128], index: 2, kind: input, shape index: {}]   ;;  %s238_s3 = inlined_call_operand.vmem [shape: f32[8,128], index: 3, kind: output, shape index: {}]  }
   0x1   :  { %150 = vmatprep.subr.bf16.mxu0 %v180_v0  ;;  %v172_v1 = vld [vmem:[%s235_s1] sm:$0xff]   ;;  %166 = vmatprep.mubr.msk.bf16.mxu0 %vm181_vm0, %v180_v0  ;;  %v173_v2 = vld [vmem:[%s235_s1 + $0x8] sm:$0xff]   ;;  %v174_v3 = vld [vmem:[%s235_s1 + $0x10] sm:$0xff]  }
   0x2   :  { %151 = vmatpush3.bf16.msra.mxu0 %v172_v1  ;;  %v175_v4 = vld [vmem:[%s235_s1 + $0x18] sm:$0xff]   ;;  %v176_v5 = vld [vmem:[%s235_s1 + $0x20] sm:$0xff]   ;;  %v177_v6 = vld [vmem:[%s235_s1 + $0x28] sm:$0xff]  }
   0x3   :  { %152 = vmatprep.subr.bf16.mxu0 %v180_v0  ;;  %v178_v7 = vld [vmem:[%s235_s1 + $0x30] sm:$0xff]   ;;  %v179_v8 = vld [vmem:[%s235_s1 + $0x38] sm:$0xff]   ;;  %v15_v9 = vld [vmem:[%s236_s0] sm:$0xf] }
   0x4   :  { %v132_v10 = vld [vmem:[%s237_s2] ss:$0 sm:$0xff] }
   0x6   :  { %153 = vmatpush3.bf16.msra.mxu0 %v173_v2 }
   0x7   :  { %154 = vmatprep.subr.bf16.mxu0 %v180_v0 }
   0xa   :  { %155 = vmatpush3.bf16.msra.mxu0 %v174_v3 }
   0xb   :  { %156 = vmatprep.subr.bf16.mxu0 %v180_v0 }
   0xe   :  { %157 = vmatpush3.bf16.msra.mxu0 %v175_v4 }
   0xf   :  { %158 = vmatprep.subr.bf16.mxu0 %v180_v0 }
  0x12   :  { %159 = vmatpush3.bf16.msra.mxu0 %v176_v5 }
  0x13   :  { %160 = vmatprep.subr.bf16.mxu0 %v180_v0 }
  0x16   :  { %161 = vmatpush3.bf16.msra.mxu0 %v177_v6 }
  0x17   :  { %162 = vmatprep.subr.bf16.mxu0 %v180_v0 }
  0x1a   :  { %163 = vmatpush3.bf16.msra.mxu0 %v178_v7 }
  0x1b   :  { %164 = vmatprep.subr.bf16.mxu0 %v180_v0 }
  0x1e   :  { %165 = vmatpush3.bf16.msra.mxu0 %v179_v8 }
  0x21   :  { %167 = vmatmul.mubr.bf16.vlgmr.msra.gmra.mrb[0].mxu0 %v15_v9 }
  0xf4   :  { %v121_v11 = vpop.f32.mrb[0].mxu0 }
  0xf5   :  { %v122_v12 = vadd.f32 %v132_v10, %v121_v11  ;;  %v168_v13 = vpop.f32.mrb[1].mxu0 }
  0xf6   :  { %v124_v14 = vpop.f32.mrb[2].mxu0 }
  0xf7   :  { %127 = vst [vmem:[%s238_s3] sm:$0xff] %v122_v12  ;;  %v169_v15 = vpop.f32.mrb[3].mxu0 }

// kernel: epsilon_net_forward.9
= control target key start
LH: loop header
LB: loop body
LE: loop exit
PB: predicated region body
PF: predicated region fallthrough
CT: control target
= control target key end

     0   :  { %v1028_v1 = vmov 0.0   ;;  %vm1029_vm0 = vmmov 0   ;;  %s1288_s1 = inlined_call_operand.vmem [shape: bf16[384,128], index: 1, kind: input, shape index: {}]   ;;  %s1289_s0 = inlined_call_operand.vmem [shape: bf16[16,384], index: 0, kind: input, shape index: {}]   ;;  %s1290_s3 = inlined_call_operand.vmem [shape: bf16[128,128], index: 3, kind: input, shape index: {}]   ;;  %s1291_s2 = inlined_call_operand.vmem [shape: f32[1,128], index: 2, kind: input, shape index: {}, may-alias: {2,4,6}]   ;;  %s1292_s5 = inlined_call_operand.vmem [shape: bf16[128,128], index: 5, kind: input, shape index: {}]   ;;  %s1293_s4 = inlined_call_operand.vmem [shape: f32[1,128], index: 4, kind: input, shape index: {}, may-alias: {2,4,6}]   ;;  %s1294_s8 = inlined_call_operand.vmem [shape: bf16[16,128], index: 8, kind: output, shape index: {0}]   ;;  %s1295_s7 = inlined_call_operand.vmem [shape: bf16[128,128], index: 7, kind: input, shape index: {}]   ;;  %s1296_s6 = inlined_call_operand.vmem [shape: f32[1,128], index: 6, kind: input, shape index: {}, may-alias: {2,4,6}]   ;;  %s1297_s9 = inlined_call_operand.vmem [shape: bf16[16,128], index: 9, kind: output, shape index: {1}]  }
   0x1   :  { %v952_v0 = vld [vmem:[%s1288_s1 + $0x40] sm:$0xff]   ;;  %870 = vmatprep.subr.bf16.mxu1 %v1028_v1  ;;  %886 = vmatprep.mubr.msk.bf16.mxu1 %vm1029_vm0, %v1028_v1  ;;  %v955_v4 = vld [vmem:[%s1288_s1 + $0x48] sm:$0xff]   ;;  %v958_v7 = vld [vmem:[%s1288_s1 + $0x50] sm:$0xff]  }
   0x2   :  { %v953_v2 = vld [vmem:[%s1288_s1] sm:$0xff]   ;;  %812 = vmatprep.subr.bf16.mxu0 %v952_v0  ;;  %v956_v5 = vld [vmem:[%s1288_s1 + $0x8] sm:$0xff]   ;;  %v959_v8 = vld [vmem:[%s1288_s1 + $0x10] sm:$0xff]  }
   0x3   :  { %v954_v3 = vld [vmem:[%s1288_s1 + $0x80] sm:$0xff]   ;;  %813 = vmatpush3.bf16.msra.mxu0 %v953_v2  ;;  %v957_v6 = vld [vmem:[%s1288_s1 + $0x88] sm:$0xff]   ;;  %v960_v9 = vld [vmem:[%s1288_s1 + $0x90] sm:$0xff]  }
   0x4   :  { %871 = vmatpush3.bf16.msra.mxu1 %v954_v3  ;;  %814 = vmatprep.subr.bf16.mxu0 %v955_v4  ;;  %v961_v10 = vld [vmem:[%s1288_s1 + $0x58] sm:$0xff]   ;;  %v964_v13 = vld [vmem:[%s1288_s1 + $0x60] sm:$0xff]   ;;  %v967_v16 = vld [vmem:[%s1288_s1 + $0x68] sm:$0xff]  }
   0x5   :  { %872 = vmatprep.subr.bf16.mxu1 %v1028_v1  ;;  %v962_v11 = vld [vmem:[%s1288_s1 + $0x18] sm:$0xff]   ;;  %v965_v14 = vld [vmem:[%s1288_s1 + $0x20] sm:$0xff]   ;;  %v968_v17 = vld [vmem:[%s1288_s1 + $0x28] sm:$0xff]  }
   0x6   :  { %v963_v12 = vld [vmem:[%s1288_s1 + $0x98] sm:$0xff]   ;;  %v966_v15 = vld [vmem:[%s1288_s1 + $0xa0] sm:$0xff]   ;;  %v969_v18 = vld [vmem:[%s1288_s1 + $0xa8] sm:$0xff]  }
   0x7   :  { %815 = vmatpush3.bf16.msra.mxu0 %v956_v5  ;;  %v970_v19 = vld [vmem:[%s1288_s1 + $0x70] sm:$0xff]   ;;  %v973_v22 = vld [vmem:[%s1288_s1 + $0x78] sm:$0xff]   ;;  %v975_v26 = vld [vmem:[%s1289_s0] ss:$12 sps:$4 sm:$0xff]  }
   0x8   :  { %873 = vmatpush3.bf16.msra.mxu1 %v957_v6  ;;  %816 = vmatprep.subr.bf16.mxu0 %v958_v7  ;;  %v971_v20 = vld [vmem:[%s1288_s1 + $0x30] sm:$0xff]   ;;  %v974_v24 = vld [vmem:[%s1288_s1 + $0x38] sm:$0xff]   ;;  %v980_v28 = vld [vmem:[%s1290_s3] sm:$0xff]  }
   0x9   :  { %874 = vmatprep.subr.bf16.mxu1 %v1028_v1  ;;  %v972_v21 = vld [vmem:[%s1288_s1 + $0xb0] sm:$0xff]   ;;  %v978_v25 = vld [vmem:[%s1288_s1 + $0xb8] sm:$0xff]   ;;  %v981_v29 = vld [vmem:[%s1290_s3 + $0x8] sm:$0xff]  }
   0xa   :  { %v977_v23 = vld [vmem:[%s1289_s0 + $0x4] ss:$12 sps:$4 sm:$0xff]   ;;  %v979_v27 = vld [vmem:[%s1289_s0 + $0x8] ss:$12 sps:$4 sm:$0xff]   ;;  %v983_v31 = vld [vmem:[%s1290_s3 + $0x18] sm:$0xff]  }
   0xb   :  { %817 = vmatpush3.bf16.msra.mxu0 %v959_v8  ;;  %283 = vmatprep.mubr.bf16.mxu0 %v977_v23  ;;  %v982_v30 = vld [vmem:[%s1290_s3 + $0x10] sm:$0xff]   ;;  %v984_v32 = vld [vmem:[%s1290_s3 + $0x20] sm:$0xff]   ;;  %v985_v33 = vld [vmem:[%s1290_s3 + $0x28] sm:$0xff]  }
   0xc   :  { %875 = vmatpush3.bf16.msra.mxu1 %v960_v9  ;;  %818 = vmatprep.subr.bf16.mxu0 %v961_v10  ;;  %v986_v34 = vld [vmem:[%s1290_s3 + $0x30] sm:$0xff]   ;;  %v987_v35 = vld [vmem:[%s1290_s3 + $0x38] sm:$0xff]   ;;  %v734_v38 = vld [vmem:[%s1291_s2] ss:$0 sm:$0xff] }
   0xd   :  { %876 = vmatprep.subr.bf16.mxu1 %v1028_v1  ;;  %v988_v62 = vld [vmem:[%s1292_s5] sm:$0xff]   ;;  %v989_v63 = vld [vmem:[%s1292_s5 + $0x8] sm:$0xff]   ;;  %v990_v0 = vld [vmem:[%s1292_s5 + $0x10] sm:$0xff]  }
   0xe   :  { %v991_v2 = vld [vmem:[%s1292_s5 + $0x18] sm:$0xff]   ;;  %v992_v3 = vld [vmem:[%s1292_s5 + $0x20] sm:$0xff]   ;;  %v993_v4 = vld [vmem:[%s1292_s5 + $0x28] sm:$0xff]  }
   0xf   :  { %819 = vmatpush3.bf16.msra.mxu0 %v962_v11  ;;  %v994_v5 = vld [vmem:[%s1292_s5 + $0x30] sm:$0xff]   ;;  %v995_v6 = vld [vmem:[%s1292_s5 + $0x38] sm:$0xff]   ;;  %v764_v7 = vld [vmem:[%s1293_s4] ss:$0 sm:$0xff] }
  0x10   :  { %877 = vmatpush3.bf16.msra.mxu1 %v963_v12  ;;  %820 = vmatprep.subr.bf16.mxu0 %v964_v13 }
  0x11   :  { %878 = vmatprep.subr.bf16.mxu1 %v1028_v1 }
  0x13   :  { %821 = vmatpush3.bf16.msra.mxu0 %v965_v14 }
  0x14   :  { %879 = vmatpush3.bf16.msra.mxu1 %v966_v15  ;;  %822 = vmatprep.subr.bf16.mxu0 %v967_v16 }
  0x15   :  { %880 = vmatprep.subr.bf16.mxu1 %v1028_v1 }
  0x17   :  { %823 = vmatpush3.bf16.msra.mxu0 %v968_v17 }
  0x18   :  { %881 = vmatpush3.bf16.msra.mxu1 %v969_v18  ;;  %824 = vmatprep.subr.bf16.mxu0 %v970_v19 }
  0x19   :  { %882 = vmatprep.subr.bf16.mxu1 %v1028_v1 }
  0x1b   :  { %825 = vmatpush3.bf16.msra.mxu0 %v971_v20 }
  0x1c   :  { %883 = vmatpush3.bf16.msra.mxu1 %v972_v21  ;;  %826 = vmatprep.subr.bf16.mxu0 %v973_v22 }
  0x1d   :  { %884 = vmatprep.subr.bf16.mxu1 %v1028_v1 }
  0x1f   :  { %827 = vmatpush3.bf16.msra.mxu0 %v974_v24 }
  0x20   :  { %885 = vmatpush3.bf16.msra.mxu1 %v978_v25  ;;  %890 = vmatprep.subr.bf16.mxu0 %v1028_v1  ;;  %v996_v25 = vld [vmem:[%s1295_s7] sm:$0xff]  }
  0x21   :  { %910 = vmatprep.subr.bf16.mxu1 %v1028_v1 }
  0x22   :  { %284 = vmatmul.mubr.bf16.vlgmr.msra.gmra.mrb[0].mxu0 %v975_v26  ;;  %v997_v26 = vld [vmem:[%s1295_s7 + $0x8] sm:$0xff]  }
  0x23   :  { %887 = vmatmul.mubr.bf16.vlgmr.msra.gmra.mrb[0].mxu1 %v979_v27  ;;  %906 = vmatprep.mubr.msk.bf16.mxu0 %vm1029_vm0, %v1028_v1  ;;  %v998_v27 = vld [vmem:[%s1295_s7 + $0x10] sm:$0xff]  }
  0x24   :  { %926 = vmatprep.mubr.msk.bf16.mxu1 %vm1029_vm0, %v1028_v1  ;;  %891 = vmatpush3.bf16.msra.mxu0 %v980_v28  ;;  %v999_v28 = vld [vmem:[%s1295_s7 + $0x18] sm:$0xff]  }
  0x25   :  { %892 = vmatprep.subr.bf16.mxu0 %v1028_v1  ;;  %911 = vmatpush3.bf16.msra.mxu1 %v988_v62 }
  0x26   :  { %912 = vmatprep.subr.bf16.mxu1 %v1028_v1 }
  0x28   :  { %893 = vmatpush3.bf16.msra.mxu0 %v981_v29  ;;  %v1000_v29 = vld [vmem:[%s1295_s7 + $0x20] sm:$0xff]  }
  0x29   :  { %894 = vmatprep.subr.bf16.mxu0 %v1028_v1  ;;  %913 = vmatpush3.bf16.msra.mxu1 %v989_v63 }
  0x2a   :  { %914 = vmatprep.subr.bf16.mxu1 %v1028_v1 }
  0x2c   :  { %895 = vmatpush3.bf16.msra.mxu0 %v982_v30  ;;  %v1001_v30 = vld [vmem:[%s1295_s7 + $0x28] sm:$0xff]  }
  0x2d   :  { %896 = vmatprep.subr.bf16.mxu0 %v1028_v1  ;;  %915 = vmatpush3.bf16.msra.mxu1 %v990_v0 }
  0x2e   :  { %916 = vmatprep.subr.bf16.mxu1 %v1028_v1 }
  0x30   :  { %897 = vmatpush3.bf16.msra.mxu0 %v983_v31  ;;  %v1002_v31 = vld [vmem:[%s1295_s7 + $0x30] sm:$0xff]  }
  0x31   :  { %898 = vmatprep.subr.bf16.mxu0 %v1028_v1  ;;  %917 = vmatpush3.bf16.msra.mxu1 %v991_v2 }
  0x32   :  { %918 = vmatprep.subr.bf16.mxu1 %v1028_v1 }
  0x34   :  { %899 = vmatpush3.bf16.msra.mxu0 %v984_v32  ;;  %v1003_v32 = vld [vmem:[%s1295_s7 + $0x38] sm:$0xff]  }
  0x35   :  { %900 = vmatprep.subr.bf16.mxu0 %v1028_v1  ;;  %919 = vmatpush3.bf16.msra.mxu1 %v992_v3 }
  0x36   :  { %920 = vmatprep.subr.bf16.mxu1 %v1028_v1 }
  0x38   :  { %901 = vmatpush3.bf16.msra.mxu0 %v985_v33  ;;  %v775_v33 = vld [vmem:[%s1296_s6] ss:$0 sm:$0xff] }
  0x39   :  { %902 = vmatprep.subr.bf16.mxu0 %v1028_v1  ;;  %921 = vmatpush3.bf16.msra.mxu1 %v993_v4 }
  0x3a   :  { %922 = vmatprep.subr.bf16.mxu1 %v1028_v1 }
  0x3c   :  { %903 = vmatpush3.bf16.msra.mxu0 %v986_v34 }
  0x3d   :  { %904 = vmatprep.subr.bf16.mxu0 %v1028_v1  ;;  %923 = vmatpush3.bf16.msra.mxu1 %v994_v5 }
  0x3e   :  { %924 = vmatprep.subr.bf16.mxu1 %v1028_v1 }
  0x40   :  { %905 = vmatpush3.bf16.msra.mxu0 %v987_v35 }
  0x41   :  { %930 = vmatprep.subr.bf16.mxu0 %v1028_v1  ;;  %925 = vmatpush3.bf16.msra.mxu1 %v995_v6 }
  0xf5   :  { %v828_v36 = vpop.f32.mrb[0].mxu0 }
  0xf6   :  { %v829_v37 = vpop.f32.mrb[1].mxu0  ;;  %v326_v39 = vpop.f32.mrb[0].mxu1 }
  0xf7   :  { %v830_v40 = vadd.f32 %v829_v37, %v828_v36  ;;  %v831_v41 = vpop.f32.mrb[2].mxu0  ;;  %v888_v42 = vpop.f32.mrb[1].mxu1 }
  0xf8   :  { %v832_v43 = vpop.f32.mrb[3].mxu0  ;;  %v329_v44 = vpop.f32.mrb[2].mxu1 }
  0xf9   :  { %v286_v45 = vadd.f32 %v830_v40, %v734_v38  ;;  %v833_v46 = vadd.f32 %v832_v43, %v831_v41  ;;  %v889_v47 = vpop.f32.mrb[3].mxu1 }
  0xfb   :  { %v327_v48 = vadd.f32 %v326_v39, %v286_v45  ;;  %v289_v49 = vadd.f32 %v833_v46, %v734_v38 }
  0xfd   :  { %v762_v50 = vmul.f32 -1.442695, %v327_v48  ;;  %v330_v51 = vadd.f32 %v329_v44, %v289_v49 }
  0xff   :  { %1004 = vpow2.f32 %v762_v50  ;;  %v763_v52 = vmul.f32 -1.442695, %v330_v51 }
 0x101   :  { %1006 = vpow2.f32 %v763_v52 }
 0x109   :  { %v1005_v53 = vpop.eup %1004 }
 0x10a   :  { %v339_v54 = vadd.f32 1.0, %v1005_v53 }
 0x10b   :  { %v1007_v55 = vpop.eup %1006 }
 0x10c   :  { %1008 = vrcp.f32 %v339_v54  ;;  %v340_v56 = vadd.f32 1.0, %v1007_v55 }
 0x10e   :  { %1010 = vrcp.f32 %v340_v56 }
 0x116   :  { %v1009_v57 = vpop.eup %1008 }
 0x117   :  { %v345_v59 = vmul.f32 %v1009_v57, %v327_v48 }
 0x118   :  { %v1011_v58 = vpop.eup %1010 }
 0x119   :  { %v346_v60 = vmul.f32 %v1011_v58, %v330_v51 }
 0x11b   :  { %v347_v61 = vpack.c.bf16 %v346_v60, %v345_v59 }
 0x11d   :  { %907 = vmatmul.mubr.bf16.vlgmr.msra.gmra.mrb[4].mxu0 %v347_v61 }
 0x11e   :  { %946 = vmatprep.mubr.msk.bf16.mxu0 %vm1029_vm0, %v1028_v1  ;;  %931 = vmatpush3.bf16.msra.mxu0 %v996_v25 }
 0x11f   :  { %932 = vmatprep.subr.bf16.mxu0 %v1028_v1 }
 0x122   :  { %933 = vmatpush3.bf16.msra.mxu0 %v997_v26 }
 0x123   :  { %934 = vmatprep.subr.bf16.mxu0 %v1028_v1 }
 0x126   :  { %935 = vmatpush3.bf16.msra.mxu0 %v998_v27 }
 0x127   :  { %936 = vmatprep.subr.bf16.mxu0 %v1028_v1 }
 0x12a   :  { %937 = vmatpush3.bf16.msra.mxu0 %v999_v28 }
 0x12b   :  { %938 = vmatprep.subr.bf16.mxu0 %v1028_v1 }
 0x12e   :  { %939 = vmatpush3.bf16.msra.mxu0 %v1000_v29 }
 0x12f   :  { %940 = vmatprep.subr.bf16.mxu0 %v1028_v1 }
 0x132   :  { %941 = vmatpush3.bf16.msra.mxu0 %v1001_v30 }
 0x133   :  { %942 = vmatprep.subr.bf16.mxu0 %v1028_v1 }
 0x136   :  { %943 = vmatpush3.bf16.msra.mxu0 %v1002_v31 }
 0x137   :  { %944 = vmatprep.subr.bf16.mxu0 %v1028_v1 }
 0x13a   :  { %945 = vmatpush3.bf16.msra.mxu0 %v1003_v32 }
 0x1f0   :  { %v453_v8 = vpop.f32.mrb[4].mxu0 }
 0x1f1   :  { %v454_v9 = vadd.f32 %v764_v7, %v453_v8  ;;  %v908_v10 = vpop.f32.mrb[5].mxu0 }
 0x1f2   :  { %v456_v11 = vpop.f32.mrb[6].mxu0 }
 0x1f3   :  { %v773_v12 = vmul.f32 -1.442695, %v454_v9  ;;  %v457_v13 = vadd.f32 %v764_v7, %v456_v11  ;;  %v909_v14 = vpop.f32.mrb[7].mxu0 }
 0x1f5   :  { %1012 = vpow2.f32 %v773_v12  ;;  %v774_v15 = vmul.f32 -1.442695, %v457_v13 }
 0x1f7   :  { %1014 = vpow2.f32 %v774_v15 }
 0x1ff   :  { %v1013_v16 = vpop.eup %1012 }
 0x200   :  { %v466_v17 = vadd.f32 1.0, %v1013_v16 }
 0x201   :  { %v1015_v18 = vpop.eup %1014 }
 0x202   :  { %1016 = vrcp.f32 %v466_v17  ;;  %v467_v19 = vadd.f32 1.0, %v1015_v18 }
 0x204   :  { %1018 = vrcp.f32 %v467_v19 }
 0x20c   :  { %v1017_v20 = vpop.eup %1016 }
 0x20d   :  { %v472_v22 = vmul.f32 %v1017_v20, %v454_v9 }
 0x20e   :  { %v1019_v21 = vpop.eup %1018 }
 0x20f   :  { %v473_v23 = vmul.f32 %v1019_v21, %v457_v13 }
 0x211   :  { %v474_v24 = vpack.c.bf16 %v473_v23, %v472_v22 }
 0x213   :  { %806 = vst [vmem:[%s1294_s8] sm:$0xff] %v474_v24   ;;  %927 = vmatmul.mubr.bf16.vlgmr.msra.gmra.mrb[4].mxu1 %v474_v24 }
 0x2e6   :  { %v580_v34 = vpop.f32.mrb[4].mxu1 }
 0x2e7   :  { %v581_v35 = vadd.f32 %v775_v33, %v580_v34  ;;  %v928_v36 = vpop.f32.mrb[5].mxu1 }
 0x2e8   :  { %v583_v37 = vpop.f32.mrb[6].mxu1 }
 0x2e9   :  { %v784_v38 = vmul.f32 -1.442695, %v581_v35  ;;  %v584_v39 = vadd.f32 %v775_v33, %v583_v37  ;;  %v929_v40 = vpop.f32.mrb[7].mxu1 }
 0x2eb   :  { %1020 = vpow2.f32 %v784_v38  ;;  %v785_v41 = vmul.f32 -1.442695, %v584_v39 }
 0x2ed   :  { %1022 = vpow2.f32 %v785_v41 }
 0x2f5   :  { %v1021_v1 = vpop.eup %1020 }
 0x2f6   :  { %v593_v42 = vadd.f32 1.0, %v1021_v1 }
 0x2f7   :  { %v1023_v43 = vpop.eup %1022 }
 0x2f8   :  { %1024 = vrcp.f32 %v593_v42  ;;  %v594_v44 = vadd.f32 1.0, %v1023_v43 }
 0x2fa   :  { %1026 = vrcp.f32 %v594_v44 }
 0x302   :  { %v1025_v45 = vpop.eup %1024 }
 0x303   :  { %v599_v47 = vmul.f32 %v1025_v45, %v581_v35 }
 0x304   :  { %v1027_v46 = vpop.eup %1026 }
 0x305   :  { %v600_v48 = vmul.f32 %v1027_v46, %v584_v39 }
 0x307   :  { %v601_v49 = vpack.c.bf16 %v600_v48, %v599_v47 }
 0x309   :  { %947 = vmatmul.mubr.bf16.vlgmr.msra.gmra.mrb[8].mxu0 %v601_v49 }
 0x3dc   :  { %v700_v50 = vpop.f32.mrb[8].mxu0 }
 0x3dd   :  { %v948_v51 = vpop.f32.mrb[9].mxu0 }
 0x3de   :  { %v703_v52 = vpop.f32.mrb[10].mxu0 }
 0x3df   :  { %v810_v53 = vpack.c.bf16 %v703_v52, %v700_v50  ;;  %v949_v54 = vpop.f32.mrb[11].mxu0 }
 0x3e1   :  { %811 = vst [vmem:[%s1297_s9] sm:$0xff] %v810_v53  }

// kernel: epsilon_net_forward.10
= control target key start
LH: loop header
LB: loop body
LE: loop exit
PB: predicated region body
PF: predicated region fallthrough
CT: control target
= control target key end

     0   :  { %v515_v0 = vmov 0.0   ;;  %vm516_vm0 = vmmov 0   ;;  %s674_s3 = inlined_call_operand.vmem [shape: bf16[128,128], index: 3, kind: input, shape index: {}]   ;;  %s675_s2 = inlined_call_operand.vmem [shape: bf16[128,128], index: 2, kind: input, shape index: {}]   ;;  %s676_s0 = inlined_call_operand.vmem [shape: f32[8,128], index: 0, kind: input, shape index: {}]   ;;  %s677_s1 = inlined_call_operand.vmem [shape: bf16[8,128], index: 1, kind: input, shape index: {}]   ;;  %s678_s5 = inlined_call_operand.vmem [shape: bf16[128,128], index: 5, kind: input, shape index: {}]   ;;  %s679_s4 = inlined_call_operand.vmem [shape: f32[1,128], index: 4, kind: input, shape index: {}, may-alias: {4,6}]   ;;  %s680_s6 = inlined_call_operand.vmem [shape: f32[1,128], index: 6, kind: input, shape index: {}, may-alias: {4,6}]   ;;  %s681_s7 = inlined_call_operand.vmem [shape: f32[8,128], index: 7, kind: output, shape index: {}]  }
   0x1   :  { %425 = vmatprep.subr.bf16.mxu0 %v515_v0  ;;  %445 = vmatprep.subr.bf16.mxu1 %v515_v0  ;;  %v487_v1 = vld [vmem:[%s674_s3] sm:$0xff]   ;;  %v489_v3 = vld [vmem:[%s674_s3 + $0x8] sm:$0xff]   ;;  %v491_v5 = vld [vmem:[%s674_s3 + $0x10] sm:$0xff]  }
   0x2   :  { %v488_v2 = vld [vmem:[%s675_s2] sm:$0xff]   ;;  %441 = vmatprep.mubr.msk.bf16.mxu0 %vm516_vm0, %v515_v0  ;;  %461 = vmatprep.mubr.msk.bf16.mxu1 %vm516_vm0, %v515_v0  ;;  %v490_v4 = vld [vmem:[%s675_s2 + $0x8] sm:$0xff]   ;;  %v492_v6 = vld [vmem:[%s675_s2 + $0x10] sm:$0xff]  }
   0x3   :  { %426 = vmatpush3.bf16.msra.mxu0 %v487_v1  ;;  %446 = vmatpush3.bf16.msra.mxu1 %v488_v2  ;;  %v493_v7 = vld [vmem:[%s674_s3 + $0x18] sm:$0xff]   ;;  %v495_v9 = vld [vmem:[%s674_s3 + $0x20] sm:$0xff]   ;;  %v497_v11 = vld [vmem:[%s674_s3 + $0x28] sm:$0xff]  }
   0x4   :  { %427 = vmatprep.subr.bf16.mxu0 %v515_v0  ;;  %447 = vmatprep.subr.bf16.mxu1 %v515_v0  ;;  %v494_v8 = vld [vmem:[%s675_s2 + $0x18] sm:$0xff]   ;;  %v496_v10 = vld [vmem:[%s675_s2 + $0x20] sm:$0xff]   ;;  %v498_v12 = vld [vmem:[%s675_s2 + $0x28] sm:$0xff]  }
   0x5   :  { %v499_v13 = vld [vmem:[%s674_s3 + $0x30] sm:$0xff]   ;;  %v501_v15 = vld [vmem:[%s674_s3 + $0x38] sm:$0xff]   ;;  %v27_v17 = vld [vmem:[%s676_s0] sm:$0xff] }
   0x6   :  { %v500_v14 = vld [vmem:[%s675_s2 + $0x30] sm:$0xff]   ;;  %v502_v16 = vld [vmem:[%s675_s2 + $0x38] sm:$0xff]   ;;  %v45_v18 = vld [vmem:[%s677_s1] sm:$0xf]  ;;  %v28_v19 = vpack.c.bf16 %v27_v17, %v27_v17 }
   0x7   :  { %428 = vmatpush3.bf16.msra.mxu0 %v489_v3  ;;  %448 = vmatpush3.bf16.msra.mxu1 %v490_v4  ;;  %v503_v20 = vld [vmem:[%s678_s5] sm:$0xff]   ;;  %v504_v21 = vld [vmem:[%s678_s5 + $0x8] sm:$0xff]   ;;  %v505_v22 = vld [vmem:[%s678_s5 + $0x10] sm:$0xff]  }
   0x8   :  { %429 = vmatprep.subr.bf16.mxu0 %v515_v0  ;;  %449 = vmatprep.subr.bf16.mxu1 %v515_v0  ;;  %v506_v23 = vld [vmem:[%s678_s5 + $0x18] sm:$0xff]   ;;  %v507_v24 = vld [vmem:[%s678_s5 + $0x20] sm:$0xff]   ;;  %v508_v25 = vld [vmem:[%s678_s5 + $0x28] sm:$0xff]  }
   0x9   :  { %v509_v26 = vld [vmem:[%s678_s5 + $0x30] sm:$0xff]   ;;  %v510_v27 = vld [vmem:[%s678_s5 + $0x38] sm:$0xff]   ;;  %v387_v30 = vld [vmem:[%s679_s4] ss:$0 sm:$0xff] }
   0xa   :  { %v389_v45 = vld [vmem:[%s680_s6] ss:$0 sm:$0xff] }
   0xb   :  { %430 = vmatpush3.bf16.msra.mxu0 %v491_v5  ;;  %450 = vmatpush3.bf16.msra.mxu1 %v492_v6 }
   0xc   :  { %431 = vmatprep.subr.bf16.mxu0 %v515_v0  ;;  %451 = vmatprep.subr.bf16.mxu1 %v515_v0 }
   0xf   :  { %432 = vmatpush3.bf16.msra.mxu0 %v493_v7  ;;  %452 = vmatpush3.bf16.msra.mxu1 %v494_v8 }
  0x10   :  { %433 = vmatprep.subr.bf16.mxu0 %v515_v0  ;;  %453 = vmatprep.subr.bf16.mxu1 %v515_v0 }
  0x13   :  { %434 = vmatpush3.bf16.msra.mxu0 %v495_v9  ;;  %454 = vmatpush3.bf16.msra.mxu1 %v496_v10 }
  0x14   :  { %435 = vmatprep.subr.bf16.mxu0 %v515_v0  ;;  %455 = vmatprep.subr.bf16.mxu1 %v515_v0 }
  0x17   :  { %436 = vmatpush3.bf16.msra.mxu0 %v497_v11  ;;  %456 = vmatpush3.bf16.msra.mxu1 %v498_v12 }
  0x18   :  { %437 = vmatprep.subr.bf16.mxu0 %v515_v0  ;;  %457 = vmatprep.subr.bf16.mxu1 %v515_v0 }
  0x1b   :  { %438 = vmatpush3.bf16.msra.mxu0 %v499_v13  ;;  %458 = vmatpush3.bf16.msra.mxu1 %v500_v14 }
  0x1c   :  { %439 = vmatprep.subr.bf16.mxu0 %v515_v0  ;;  %459 = vmatprep.subr.bf16.mxu1 %v515_v0 }
  0x1f   :  { %440 = vmatpush3.bf16.msra.mxu0 %v501_v15  ;;  %460 = vmatpush3.bf16.msra.mxu1 %v502_v16 }
  0x20   :  { %465 = vmatprep.subr.bf16.mxu0 %v515_v0 }
  0x22   :  { %442 = vmatmul.mubr.bf16.vlgmr.msra.gmra.mrb[0].mxu0 %v45_v18  ;;  %462 = vmatmul.mubr.bf16.vlgmr.msra.gmra.mrb[0].mxu1 %v28_v19 }
  0x23   :  { %481 = vmatprep.mubr.msk.bf16.mxu0 %vm516_vm0, %v515_v0  ;;  %466 = vmatpush3.bf16.msra.mxu0 %v503_v20 }
  0x24   :  { %467 = vmatprep.subr.bf16.mxu0 %v515_v0 }
  0x27   :  { %468 = vmatpush3.bf16.msra.mxu0 %v504_v21 }
  0x28   :  { %469 = vmatprep.subr.bf16.mxu0 %v515_v0 }
  0x2b   :  { %470 = vmatpush3.bf16.msra.mxu0 %v505_v22 }
  0x2c   :  { %471 = vmatprep.subr.bf16.mxu0 %v515_v0 }
  0x2f   :  { %472 = vmatpush3.bf16.msra.mxu0 %v506_v23 }
  0x30   :  { %473 = vmatprep.subr.bf16.mxu0 %v515_v0 }
  0x33   :  { %474 = vmatpush3.bf16.msra.mxu0 %v507_v24 }
  0x34   :  { %475 = vmatprep.subr.bf16.mxu0 %v515_v0 }
  0x37   :  { %476 = vmatpush3.bf16.msra.mxu0 %v508_v25 }
  0x38   :  { %477 = vmatprep.subr.bf16.mxu0 %v515_v0 }
  0x3b   :  { %478 = vmatpush3.bf16.msra.mxu0 %v509_v26 }
  0x3c   :  { %479 = vmatprep.subr.bf16.mxu0 %v515_v0 }
  0x3f   :  { %480 = vmatpush3.bf16.msra.mxu0 %v510_v27 }
  0xf5   :  { %v144_v28 = vpop.f32.mrb[0].mxu0  ;;  %v232_v29 = vpop.f32.mrb[0].mxu1 }
  0xf6   :  { %v443_v31 = vpop.f32.mrb[1].mxu0  ;;  %v233_v32 = vadd.f32 %v232_v29, %v144_v28  ;;  %v463_v33 = vpop.f32.mrb[1].mxu1 }
  0xf7   :  { %v147_v34 = vpop.f32.mrb[2].mxu0  ;;  %v235_v35 = vpop.f32.mrb[2].mxu1 }
  0xf8   :  { %v444_v36 = vpop.f32.mrb[3].mxu0  ;;  %v245_v37 = vadd.f32 %v387_v30, %v233_v32  ;;  %v464_v38 = vpop.f32.mrb[3].mxu1 }
  0xfa   :  { %v388_v39 = vmul.f32 -1.442695, %v245_v37 }
  0xfc   :  { %511 = vpow2.f32 %v388_v39 }
 0x106   :  { %v512_v40 = vpop.eup %511 }
 0x107   :  { %v249_v41 = vadd.f32 1.0, %v512_v40 }
 0x109   :  { %513 = vrcp.f32 %v249_v41 }
 0x113   :  { %v514_v42 = vpop.eup %513 }
 0x114   :  { %v252_v43 = vmul.f32 %v514_v42, %v245_v37 }
 0x116   :  { %v253_v44 = vpack.c.bf16 %v252_v43, %v252_v43 }
 0x118   :  { %482 = vmatmul.mubr.bf16.vlgmr.msra.gmra.mrb[4].mxu0 %v253_v44 }
 0x1eb   :  { %v359_v46 = vpop.f32.mrb[4].mxu0 }
 0x1ec   :  { %v360_v47 = vadd.f32 %v389_v45, %v359_v46  ;;  %v483_v48 = vpop.f32.mrb[5].mxu0 }
 0x1ed   :  { %v362_v49 = vpop.f32.mrb[6].mxu0 }
 0x1ee   :  { %v365_v50 = vadd.f32 %v360_v47, %v27_v17  ;;  %v484_v51 = vpop.f32.mrb[7].mxu0 }
 0x1f0   :  { %366 = vst [vmem:[%s681_s7] sm:$0xff] %v365_v50 }

</bundles_post_ra>
